<compile_context>
chip_gen: v7x
topology: tpu7x:2x2x1
jax: 0.10.0
libtpu: 0.0.40
codegen_flags: <defaults>
</compile_context>

<pallas_src>
import jax
import jax.numpy as jnp
from jax.experimental import pallas as pl
from jax.experimental.pallas import tpu as pltpu


def mlp_kernel(x_ref,
               w1_ref, b1_ref,
               w2_ref, b2_ref,
               w3_ref, b3_ref,
               w4_ref, b4_ref,
               o_ref):
    x = x_ref[...]

    # linear1 + relu
    h = jnp.dot(x, w1_ref[...], preferred_element_type=jnp.float32) + b1_ref[...]
    h = jnp.maximum(h, 0.0)
    # linear2 + relu
    h = jnp.dot(h, w2_ref[...], preferred_element_type=jnp.float32) + b2_ref[...]
    h = jnp.maximum(h, 0.0)
    # linear3 + relu
    h = jnp.dot(h, w3_ref[...], preferred_element_type=jnp.float32) + b3_ref[...]
    h = jnp.maximum(h, 0.0)
    # output (lane-padded to a multiple of 128) + sigmoid (exp on EUP)
    h = jnp.dot(h, w4_ref[...], preferred_element_type=jnp.float32) + b4_ref[...]
    out = jax.nn.sigmoid(h)

    o_ref[...] = out.astype(o_ref.dtype)


def _round_up(x, m):
    return ((x + m - 1) // m) * m


def _pick_tile(B, max_tile):
    """Large tiles amortize per-step overhead; keep >=4 grid steps when B allows."""
    if B <= max_tile:
        return B                      # single full-batch step (legal: full-array block)
    tile = min(max_tile, _round_up(pl.cdiv(B, 4), 256))
    return max(tile, 256)


def mlp_forward(x, params, *, batch_tile=2048):
    """x: (B, in_features) f32.  params: dict of (in,out) weights and (1,out) biases."""
    B, in_features = x.shape
    out_features = params["w4"].shape[1]

    # ---- batch tiling -------------------------------------------------------
    tile = _pick_tile(B, batch_tile)
    pad = (-B) % tile
    if pad:
        x = jnp.pad(x, ((0, pad), (0, 0)))
    Bp = B + pad
    grid = (Bp // tile,)

    # ---- lane-dense output: zero-pad the last layer to a multiple of 128 ----
    out_pad = _round_up(out_features, 128)
    w4 = params["w4"]
    b4 = params["b4"]
    if out_pad != out_features:
        w4 = jnp.pad(w4, ((0, 0), (0, out_pad - out_features)))
        b4 = jnp.pad(b4, ((0, 0), (0, out_pad - out_features)))  # zeros, not random

    weight_list = [params["w1"], params["b1"],
                   params["w2"], params["b2"],
                   params["w3"], params["b3"],
                   w4, b4]

    # Full-array (constant block index) spec for every weight / bias; they stay
    # resident in VMEM across grid steps.
    def full_spec(arr):
        nd = arr.ndim
        return pl.BlockSpec(arr.shape, lambda i, _nd=nd: (0,) * _nd)

    in_specs = [pl.BlockSpec((tile, in_features), lambda i: (i, 0))]
    in_specs += [full_spec(a) for a in weight_list]
    out_spec = pl.BlockSpec((tile, out_pad), lambda i: (i, 0))

    # ---- explicit VMEM budget (safe on v5e 16 MiB scoped / v7x 64 MiB phys) --
    bytes_x = tile * in_features * 4 * 2          # double-buffered input tile
    bytes_out = tile * out_pad * 4 * 2            # double-buffered output tile
    bytes_w = sum(int(a.size) for a in weight_list) * 4
    bytes_inter = tile * 256 * 4 * 3              # layer intermediates (conservative)
    vmem_bytes = int(min(max((bytes_x + bytes_out + bytes_w + bytes_inter) * 2,
                             16 << 20), 48 << 20))

    out = pl.pallas_call(
        mlp_kernel,
        out_shape=jax.ShapeDtypeStruct((Bp, out_pad), jnp.float32),
        grid_spec=pltpu.PrefetchScalarGridSpec(
            num_scalar_prefetch=0,
            grid=grid,
            in_specs=in_specs,
            out_specs=out_spec,
        ),
        compiler_params=pltpu.CompilerParams(
            dimension_semantics=("parallel",),
            vmem_limit_bytes=vmem_bytes),
    )(x, *weight_list)

    return out[:B, :out_features]


def init_params(key, in_features, out_features):
    """Deterministic init mirroring nn.Linear shapes (weights stored transposed)."""
    dims = [(in_features, 256), (256, 128), (128, 32), (32, out_features)]
    params = {}
    for idx, (din, dout) in enumerate(dims, start=1):
        key, kw, kb = jax.random.split(key, 3)
        bound = 1.0 / jnp.sqrt(din)
        params[f"w{idx}"] = jax.random.uniform(
            kw, (din, dout), jnp.float32, -bound, bound)
        params[f"b{idx}"] = jax.random.uniform(
            kb, (1, dout), jnp.float32, -bound, bound)
    return params


def mlp_reference(x, params):
    h = jnp.maximum(x @ params["w1"] + params["b1"], 0.0)
    h = jnp.maximum(h @ params["w2"] + params["b2"], 0.0)
    h = jnp.maximum(h @ params["w3"] + params["b3"], 0.0)
    return jax.nn.sigmoid(h @ params["w4"] + params["b4"])


if __name__ == "__main__":
    key = jax.random.PRNGKey(0)
    in_features, out_features = 32, 4
    batch = 128  # small demo batch; tile selection scales up automatically for large B

    key, kx = jax.random.split(key)
    x = jax.random.normal(kx, (batch, in_features), jnp.float32)
    params = init_params(key, in_features, out_features)

    out = mlp_forward(x, params)
    out = jax.block_until_ready(out)

    ref = mlp_reference(x, params)
    assert out.shape == (batch, out_features)
    assert jnp.allclose(out, ref, atol=1e-5, rtol=1e-5), "mismatch vs reference"

    # Exercise the non-multiple / tiny-batch path once for correctness.
    out_small = jax.block_until_ready(mlp_forward(x[:10], params))
    assert jnp.allclose(out_small, ref[:10], atol=1e-5, rtol=1e-5), "small-batch mismatch"

    # Exercise the multi-step (tiled) grid path: B larger than one tile.
    key, kx2 = jax.random.split(key)
    x_big = jax.random.normal(kx2, (4100, in_features), jnp.float32)
    out_big = jax.block_until_ready(mlp_forward(x_big, params, batch_tile=1024))
    ref_big = mlp_reference(x_big, params)
    assert jnp.allclose(out_big, ref_big, atol=1e-5, rtol=1e-5), "tiled-batch mismatch"

    print("KERNEL_OK")
</pallas_src>

<mosaic_0001>
module attributes {stable_mosaic.version = 11 : i64} {
  func.func @mlp_kernel(%arg0: i32, %arg1: memref<128x32xf32, #tpu.memory_space<vmem>>, %arg2: memref<32x256xf32, #tpu.memory_space<vmem>>, %arg3: memref<1x256xf32, #tpu.memory_space<vmem>>, %arg4: memref<256x128xf32, #tpu.memory_space<vmem>>, %arg5: memref<1x128xf32, #tpu.memory_space<vmem>>, %arg6: memref<128x32xf32, #tpu.memory_space<vmem>>, %arg7: memref<1x32xf32, #tpu.memory_space<vmem>>, %arg8: memref<32x128xf32, #tpu.memory_space<vmem>>, %arg9: memref<1x128xf32, #tpu.memory_space<vmem>>, %arg10: memref<128x128xf32, #tpu.memory_space<vmem>>) attributes {dimension_semantics = [#tpu.dimension_semantics<parallel>], iteration_bounds = array<i64: 1>, scalar_prefetch = 0 : i64, scratch_operands = 0 : i64, tpu.core_type = #tpu.core_type<tc>, window_params = [{transform_indices = @transform_0, window_bounds = array<i64: 128, 32>}, {pipeline_mode = #tpu.pipeline_mode<synchronous>, transform_indices = @transform_1, window_bounds = array<i64: 32, 256>}, {pipeline_mode = #tpu.pipeline_mode<synchronous>, transform_indices = @transform_2, window_bounds = array<i64: 1, 256>}, {pipeline_mode = #tpu.pipeline_mode<synchronous>, transform_indices = @transform_3, window_bounds = array<i64: 256, 128>}, {pipeline_mode = #tpu.pipeline_mode<synchronous>, transform_indices = @transform_4, window_bounds = array<i64: 1, 128>}, {pipeline_mode = #tpu.pipeline_mode<synchronous>, transform_indices = @transform_5, window_bounds = array<i64: 128, 32>}, {pipeline_mode = #tpu.pipeline_mode<synchronous>, transform_indices = @transform_6, window_bounds = array<i64: 1, 32>}, {pipeline_mode = #tpu.pipeline_mode<synchronous>, transform_indices = @transform_7, window_bounds = array<i64: 32, 128>}, {pipeline_mode = #tpu.pipeline_mode<synchronous>, transform_indices = @transform_8, window_bounds = array<i64: 1, 128>}, {transform_indices = @transform_9, window_bounds = array<i64: 128, 128>}]} {
    %c0 = arith.constant 0 : index
    %c0_0 = arith.constant 0 : index
    %0 = vector.load %arg1[%c0, %c0_0] : memref<128x32xf32, #tpu.memory_space<vmem>>, vector<128x32xf32>
    %c0_1 = arith.constant 0 : index
    %c0_2 = arith.constant 0 : index
    %1 = vector.load %arg2[%c0_1, %c0_2] : memref<32x256xf32, #tpu.memory_space<vmem>>, vector<32x256xf32>
    %cst = arith.constant dense<0.000000e+00> : vector<128x256xf32>
    %2 = tpu.matmul %0, %1, %cst {dimension_numbers = #tpu.dot_dimension_numbers<[1], [0], [0], [1], [0, 0, 1, 1], [], []>} : vector<128x32xf32>, vector<32x256xf32>, vector<128x256xf32> -> vector<128x256xf32>
    %c0_3 = arith.constant 0 : index
    %c0_4 = arith.constant 0 : index
    %3 = vector.load %arg3[%c0_3, %c0_4] : memref<1x256xf32, #tpu.memory_space<vmem>>, vector<1x256xf32>
    %4 = vector.broadcast %3 : vector<1x256xf32> to vector<128x256xf32>
    %5 = arith.addf %2, %4 : vector<128x256xf32>
    %cst_5 = arith.constant 0.000000e+00 : f32
    %6 = vector.broadcast %cst_5 : f32 to vector<128x256xf32>
    %7 = arith.maximumf %5, %6 : vector<128x256xf32>
    %c0_6 = arith.constant 0 : index
    %c0_7 = arith.constant 0 : index
    %8 = vector.load %arg4[%c0_6, %c0_7] : memref<256x128xf32, #tpu.memory_space<vmem>>, vector<256x128xf32>
    %cst_8 = arith.constant dense<0.000000e+00> : vector<128x128xf32>
    %9 = tpu.matmul %7, %8, %cst_8 {dimension_numbers = #tpu.dot_dimension_numbers<[1], [0], [0], [1], [0, 0, 1, 1], [], []>} : vector<128x256xf32>, vector<256x128xf32>, vector<128x128xf32> -> vector<128x128xf32>
    %c0_9 = arith.constant 0 : index
    %c0_10 = arith.constant 0 : index
    %10 = vector.load %arg5[%c0_9, %c0_10] : memref<1x128xf32, #tpu.memory_space<vmem>>, vector<1x128xf32>
    %11 = vector.broadcast %10 : vector<1x128xf32> to vector<128x128xf32>
    %12 = arith.addf %9, %11 : vector<128x128xf32>
    %cst_11 = arith.constant 0.000000e+00 : f32
    %13 = vector.broadcast %cst_11 : f32 to vector<128x128xf32>
    %14 = arith.maximumf %12, %13 : vector<128x128xf32>
    %c0_12 = arith.constant 0 : index
    %c0_13 = arith.constant 0 : index
    %15 = vector.load %arg6[%c0_12, %c0_13] : memref<128x32xf32, #tpu.memory_space<vmem>>, vector<128x32xf32>
    %cst_14 = arith.constant dense<0.000000e+00> : vector<128x32xf32>
    %16 = tpu.matmul %14, %15, %cst_14 {dimension_numbers = #tpu.dot_dimension_numbers<[1], [0], [0], [1], [0, 0, 1, 1], [], []>} : vector<128x128xf32>, vector<128x32xf32>, vector<128x32xf32> -> vector<128x32xf32>
    %c0_15 = arith.constant 0 : index
    %c0_16 = arith.constant 0 : index
    %17 = vector.load %arg7[%c0_15, %c0_16] : memref<1x32xf32, #tpu.memory_space<vmem>>, vector<1x32xf32>
    %18 = vector.broadcast %17 : vector<1x32xf32> to vector<128x32xf32>
    %19 = arith.addf %16, %18 : vector<128x32xf32>
    %cst_17 = arith.constant 0.000000e+00 : f32
    %20 = vector.broadcast %cst_17 : f32 to vector<128x32xf32>
    %21 = arith.maximumf %19, %20 : vector<128x32xf32>
    %c0_18 = arith.constant 0 : index
    %c0_19 = arith.constant 0 : index
    %22 = vector.load %arg8[%c0_18, %c0_19] : memref<32x128xf32, #tpu.memory_space<vmem>>, vector<32x128xf32>
    %cst_20 = arith.constant dense<0.000000e+00> : vector<128x128xf32>
    %23 = tpu.matmul %21, %22, %cst_20 {dimension_numbers = #tpu.dot_dimension_numbers<[1], [0], [0], [1], [0, 0, 1, 1], [], []>} : vector<128x32xf32>, vector<32x128xf32>, vector<128x128xf32> -> vector<128x128xf32>
    %c0_21 = arith.constant 0 : index
    %c0_22 = arith.constant 0 : index
    %24 = vector.load %arg9[%c0_21, %c0_22] : memref<1x128xf32, #tpu.memory_space<vmem>>, vector<1x128xf32>
    %25 = vector.broadcast %24 : vector<1x128xf32> to vector<128x128xf32>
    %26 = arith.addf %23, %25 : vector<128x128xf32>
    %27 = arith.negf %26 : vector<128x128xf32>
    %28 = math.exp %27 : vector<128x128xf32>
    %cst_23 = arith.constant 1.000000e+00 : f32
    %29 = vector.broadcast %cst_23 : f32 to vector<128x128xf32>
    %30 = arith.addf %29, %28 : vector<128x128xf32>
    %31 = arith.divf %29, %30 : vector<128x128xf32>
    %c0_24 = arith.constant 0 : index
    %c0_25 = arith.constant 0 : index
    %32 = vector.load %arg10[%c0_24, %c0_25] : memref<128x128xf32, #tpu.memory_space<vmem>>, vector<128x128xf32>
    tpu.vector_store %arg10[%c0_24, %c0_25], %31 {strides = array<i32>} : memref<128x128xf32, #tpu.memory_space<vmem>>, vector<128x128xf32>,
    return
  }
  func.func @transform_0(%arg0: i32) -> (i32, i32) {
    %c0_i32 = arith.constant 0 : i32
    %c0_i32_0 = arith.constant 0 : i32
    return %arg0, %c0_i32 : i32, i32
  }
  func.func @transform_1(%arg0: i32) -> (i32, i32) {
    %c0_i32 = arith.constant 0 : i32
    %c0_i32_0 = arith.constant 0 : i32
    %c0_i32_1 = arith.constant 0 : i32
    return %c0_i32, %c0_i32_0 : i32, i32
  }
  func.func @transform_2(%arg0: i32) -> (i32, i32) {
    %c0_i32 = arith.constant 0 : i32
    %c0_i32_0 = arith.constant 0 : i32
    %c0_i32_1 = arith.constant 0 : i32
    return %c0_i32, %c0_i32_0 : i32, i32
  }
  func.func @transform_3(%arg0: i32) -> (i32, i32) {
    %c0_i32 = arith.constant 0 : i32
    %c0_i32_0 = arith.constant 0 : i32
    %c0_i32_1 = arith.constant 0 : i32
    return %c0_i32, %c0_i32_0 : i32, i32
  }
  func.func @transform_4(%arg0: i32) -> (i32, i32) {
    %c0_i32 = arith.constant 0 : i32
    %c0_i32_0 = arith.constant 0 : i32
    %c0_i32_1 = arith.constant 0 : i32
    return %c0_i32, %c0_i32_0 : i32, i32
  }
  func.func @transform_5(%arg0: i32) -> (i32, i32) {
    %c0_i32 = arith.constant 0 : i32
    %c0_i32_0 = arith.constant 0 : i32
    %c0_i32_1 = arith.constant 0 : i32
    return %c0_i32, %c0_i32_0 : i32, i32
  }
  func.func @transform_6(%arg0: i32) -> (i32, i32) {
    %c0_i32 = arith.constant 0 : i32
    %c0_i32_0 = arith.constant 0 : i32
    %c0_i32_1 = arith.constant 0 : i32
    return %c0_i32, %c0_i32_0 : i32, i32
  }
  func.func @transform_7(%arg0: i32) -> (i32, i32) {
    %c0_i32 = arith.constant 0 : i32
    %c0_i32_0 = arith.constant 0 : i32
    %c0_i32_1 = arith.constant 0 : i32
    return %c0_i32, %c0_i32_0 : i32, i32
  }
  func.func @transform_8(%arg0: i32) -> (i32, i32) {
    %c0_i32 = arith.constant 0 : i32
    %c0_i32_0 = arith.constant 0 : i32
    %c0_i32_1 = arith.constant 0 : i32
    return %c0_i32, %c0_i32_0 : i32, i32
  }
  func.func @transform_9(%arg0: i32) -> (i32, i32) {
    %c0_i32 = arith.constant 0 : i32
    %c0_i32_0 = arith.constant 0 : i32
    return %arg0, %c0_i32 : i32, i32
  }
}

</mosaic_0001>

<bundles_post_ra>
// kernel: tpu_custom_call.1
= control target key start
LH: loop header
LB: loop body
LE: loop exit
PB: predicated region body
PF: predicated region fallthrough
CT: control target
= control target key end

     0   :  { %14 = vsyncpa [#allocation3], 0  ;;  %s1947_s0 = inlined_call_operand.vmem [shape: f32[128,32], index: 0, kind: input, shape index: {}]   ;;  %s1948_s1 = inlined_call_operand.vmem [shape: f32[32,256], index: 1, kind: input, shape index: {}]   ;;  %s1949_s2 = inlined_call_operand.vmem [shape: f32[1,256], index: 2, kind: input, shape index: {}]   ;;  %s1950_s3 = inlined_call_operand.vmem [shape: f32[256,128], index: 3, kind: input, shape index: {}]   ;;  %s1951_s4 = inlined_call_operand.vmem [shape: f32[1,128], index: 4, kind: input, shape index: {}]   ;;  %s1952_s5 = inlined_call_operand.vmem [shape: f32[128,32], index: 5, kind: input, shape index: {}]   ;;  %s1953_s6 = inlined_call_operand.vmem [shape: f32[1,32], index: 6, kind: input, shape index: {}]   ;;  %s1954_s7 = inlined_call_operand.hbm [shape: f32[32,128], index: 7, kind: input, shape index: {}]   ;;  %s1955_s8 = inlined_call_operand.vmem [shape: f32[1,128], index: 8, kind: input, shape index: {}]   ;;  %s1956_s9 = inlined_call_operand.hbm [shape: f32[128,128], index: 9, kind: output, shape index: {}]  }
   0x1   :  { %15 = vsyncpa [#allocation4], 0  ;;  %s1514_s30 = smov [#allocation2]   ;;  %s1466_s13 = scalar_lea.hbm %s1954_s7, 512 }
   0x2   :  { %s35_s10 = sshll.u32 %s1514_s30, 4  ;;  %p1467_p0 = scmp.ne.s32.totalorder %s1954_s7, %s1466_s13  ;;  %s36_s10 = int_to_ptr.vmem [resolvable:$true] %s35_s10 }
   0x3   :  { %p1470_p1 = scmp.lt.u32.totalorder %s1466_s13, %s1954_s7 }
   0x5   :  { %p1472_p2 = pnand %p1470_p1, %p1467_p0 }
   0x7   :  { %1475 = shalt.err (!%p1472_p2)
}
   0x8   :  { %s1476_s18 = scalar_lea.vmem %s36_s10, 512  ;;  %p1481_p4 = scmp.lt.s32.totalorder %s36_s10, %s36_s10 }
   0x9   :  { %p1477_p3 = scmp.ne.s32.totalorder %s36_s10, %s1476_s18  ;;  %p1482_p5 = scmp.lt.s32.totalorder %s1476_s18, %s1476_s18 }
   0xb   :  { %p1483_p6 = por %p1482_p5, %p1481_p4 }
   0xd   :  { %p1484_p7 = pnand %p1483_p6, %p1477_p3 }
   0xf   :  { %1487 = shalt.err (!%p1484_p7)
}
  0x10   :  { %s1515_s19 = smov 128   ;;  %s1516_s20 = smov 8  }
  0x11   :  { %41 = dma.hbm_to_vmem [thread:$0]  %s1954_s7, 512, %s36_s10, [#allocation3], %s1515_s19, %s1515_s19, %s1516_s20  }
  0x12   :  { %1510 = dma.done.wait [#allocation3], 512  }
  0x13   :  { %1511 = vsyncadd [#allocation3], 4294966784  ;;  %v1517_v0 = vmov 0.0   ;;  %v64_v1 = vld [vmem:[%s1948_s1 + $0x8] sm:$0xff]  ;;  %v66_v2 = vld [vmem:[%s1948_s1 + $0x18] sm:$0xff]  ;;  %vm83_vm0 = vcmask 261120  }
  0x14   :  { %196 = vmatprep.mubr.f32.mxu0 %v1517_v0  ;;  %v63_v3 = vld [vmem:[%s1948_s1] sm:$0xff]  ;;  %v1313_v4 = vpack.c.bf16 %v66_v2, %v64_v1  ;;  %v65_v5 = vld [vmem:[%s1948_s1 + $0x10] sm:$0xff]  ;;  %v68_v6 = vld [vmem:[%s1948_s1 + $0x28] sm:$0xff] }
  0x15   :  { %v70_v7 = vld [vmem:[%s1948_s1 + $0x38] sm:$0xff]  ;;  %v1315_v8 = vpack.c.bf16 %v65_v5, %v63_v3  ;;  %v67_v10 = vld [vmem:[%s1948_s1 + $0x20] sm:$0xff]  ;;  %v69_v11 = vld [vmem:[%s1948_s1 + $0x30] sm:$0xff] }
  0x16   :  { %v1317_v9 = vpack.c.bf16 %v70_v7, %v68_v6  ;;  %1314 = vmatprep.subr.bf16.mxu0 %v1313_v4  ;;  %v1319_v12 = vpack.c.bf16 %v69_v11, %v67_v10  ;;  %v47_v13 = vld [vmem:[%s1947_s0] sm:$0xff]  ;;  %v342_v15 = vld [vmem:[%s1950_s3 + $0x88] sm:$0xff]  ;;  %v343_v19 = vld [vmem:[%s1950_s3 + $0x90] sm:$0xff] }
  0x17   :  { %1316 = vmatpush1.bf16.msra.mxu0 %v1315_v8  ;;  %v341_v14 = vld [vmem:[%s1950_s3 + $0x80] sm:$0xff]  ;;  %v326_v18 = vld [vmem:[%s1950_s3 + $0x8] sm:$0xff]  ;;  %v344_v20 = vld [vmem:[%s1950_s3 + $0x98] sm:$0xff] }
  0x18   :  { %1318 = vmatprep.subr.bf16.mxu0 %v1317_v9  ;;  %v325_v16 = vld [vmem:[%s1950_s3] sm:$0xff]  ;;  %v1321_v17 = vpack.c.bf16 %v342_v15, %v341_v14  ;;  %v1325_v22 = vpack.c.bf16 %v344_v20, %v343_v19  ;;  %v327_v23 = vld [vmem:[%s1950_s3 + $0x10] sm:$0xff]  ;;  %v328_v24 = vld [vmem:[%s1950_s3 + $0x18] sm:$0xff] }
  0x19   :  { %v1323_v21 = vpack.c.bf16 %v326_v18, %v325_v16  ;;  %v345_v25 = vld [vmem:[%s1950_s3 + $0xa0] sm:$0xff]  ;;  %v346_v26 = vld [vmem:[%s1950_s3 + $0xa8] sm:$0xff]  ;;  %v1327_v28 = vpack.c.bf16 %v328_v24, %v327_v23  ;;  %v347_v32 = vld [vmem:[%s1950_s3 + $0xb0] sm:$0xff] }
  0x1a   :  { %1322 = vmatprep.subr.bf16.mxu1 %v1321_v17  ;;  %v48_v27 = vld [vmem:[%s1947_s0 + $0x8] sm:$0xff]  ;;  %v1329_v29 = vpack.c.bf16 %v346_v26, %v345_v25  ;;  %v329_v30 = vld [vmem:[%s1950_s3 + $0x20] sm:$0xff]  ;;  %v348_v33 = vld [vmem:[%s1950_s3 + $0xb8] sm:$0xff] }
  0x1b   :  { %1320 = vmatpush1.bf16.msra.mxu0 %v1319_v12  ;;  %1324 = vmatpush3.bf16.msra.mxu1 %v1323_v21  ;;  %v330_v31 = vld [vmem:[%s1950_s3 + $0x28] sm:$0xff]  ;;  %v49_v34 = vld [vmem:[%s1947_s0 + $0x10] sm:$0xff]  ;;  %v1333_v36 = vpack.c.bf16 %v348_v33, %v347_v32  ;;  %v332_v38 = vld [vmem:[%s1950_s3 + $0x38] sm:$0xff] }
  0x1c   :  { %1326 = vmatprep.subr.bf16.mxu1 %v1325_v22  ;;  %v1331_v35 = vpack.c.bf16 %v330_v31, %v329_v30  ;;  %v331_v37 = vld [vmem:[%s1950_s3 + $0x30] sm:$0xff]  ;;  %v349_v39 = vld [vmem:[%s1950_s3 + $0xc0] sm:$0xff]  ;;  %v350_v40 = vld [vmem:[%s1950_s3 + $0xc8] sm:$0xff] }
  0x1d   :  { %v50_v41 = vld [vmem:[%s1947_s0 + $0x18] sm:$0xff]  ;;  %v1335_v42 = vpack.c.bf16 %v332_v38, %v331_v37  ;;  %v1337_v43 = vpack.c.bf16 %v350_v40, %v349_v39  ;;  %v333_v44 = vld [vmem:[%s1950_s3 + $0x40] sm:$0xff]  ;;  %v334_v45 = vld [vmem:[%s1950_s3 + $0x48] sm:$0xff] }
  0x1e   :  { %1042 = vmatmul.mubr.msk.f32.vlgmr.msra.gmra.mrb[0].mxu0 %vm83_vm0, %v47_v13  ;;  %v351_v46 = vld [vmem:[%s1950_s3 + $0xd0] sm:$0xff]  ;;  %v352_v47 = vld [vmem:[%s1950_s3 + $0xd8] sm:$0xff]  ;;  %v51_v48 = vld [vmem:[%s1947_s0 + $0x20] sm:$0xff]  ;;  %v1339_v49 = vpack.c.bf16 %v334_v45, %v333_v44 }
  0x1f   :  { %202 = vmatprep.mubr.f32.mxu0 %v1517_v0  ;;  %1328 = vmatpush3.bf16.msra.mxu1 %v1327_v28  ;;  %v1341_v50 = vpack.c.bf16 %v352_v47, %v351_v46  ;;  %v335_v51 = vld [vmem:[%s1950_s3 + $0x50] sm:$0xff]  ;;  %v336_v52 = vld [vmem:[%s1950_s3 + $0x58] sm:$0xff]  ;;  %v353_v53 = vld [vmem:[%s1950_s3 + $0xe0] sm:$0xff]  ;;  %v73_v28 = vlaneseq }
  0x20   :  { %1330 = vmatprep.subr.bf16.mxu1 %v1329_v29  ;;  %v354_v54 = vld [vmem:[%s1950_s3 + $0xe8] sm:$0xff]  ;;  %v1343_v56 = vpack.c.bf16 %v336_v52, %v335_v51  ;;  %v53_v58 = vld [vmem:[%s1947_s0 + $0x30] sm:$0xff]  ;;  %v54_v59 = vld [vmem:[%s1947_s0 + $0x38] sm:$0xff] }
  0x21   :  { %v52_v55 = vld [vmem:[%s1947_s0 + $0x28] sm:$0xff]  ;;  %v1345_v57 = vpack.c.bf16 %v354_v54, %v353_v53  ;;  %v55_v60 = vld [vmem:[%s1947_s0 + $0x40] sm:$0xff]  ;;  %v57_v62 = vld [vmem:[%s1947_s0 + $0x50] sm:$0xff]  ;;  %v74_v29 = vshrl.u32 %v73_v28, 7 }
  0x22   :  { %1043 = vmatmul.mubr.msk.f32.gmra.mrb[2].mxu0 %vm83_vm0, %v48_v27  ;;  %v56_v61 = vld [vmem:[%s1947_s0 + $0x48] sm:$0xff]  ;;  %v58_v63 = vld [vmem:[%s1947_s0 + $0x58] sm:$0xff]  ;;  %v59_v1 = vld [vmem:[%s1947_s0 + $0x60] sm:$0xff] }
  0x23   :  { %208 = vmatprep.mubr.f32.mxu0 %v1517_v0  ;;  %1332 = vmatpush3.bf16.msra.mxu1 %v1331_v35  ;;  %v60_v2 = vld [vmem:[%s1947_s0 + $0x68] sm:$0xff]  ;;  %v61_v3 = vld [vmem:[%s1947_s0 + $0x70] sm:$0xff]  ;;  %v62_v4 = vld [vmem:[%s1947_s0 + $0x78] sm:$0xff]  ;;  %v75_v30 = vsub.s32 0, %v74_v29  ;;  %v79_v32 = vsub.s32 1, %v74_v29 }
  0x24   :  { %1334 = vmatprep.subr.bf16.mxu1 %v1333_v36  ;;  %v337_v5 = vld [vmem:[%s1950_s3 + $0x60] sm:$0xff]  ;;  %v338_v6 = vld [vmem:[%s1950_s3 + $0x68] sm:$0xff]  ;;  %v356_v8 = vld [vmem:[%s1950_s3 + $0xf8] sm:$0xff] }
  0x25   :  { %v1347_v7 = vpack.c.bf16 %v338_v6, %v337_v5  ;;  %v339_v10 = vld [vmem:[%s1950_s3 + $0x70] sm:$0xff]  ;;  %v340_v11 = vld [vmem:[%s1950_s3 + $0x78] sm:$0xff]  ;;  %v525_v13 = vld [vmem:[%s1952_s5] sm:$0xff] }
  0x26   :  { %1044 = vmatmul.mubr.msk.f32.gmra.mrb[4].mxu0 %vm83_vm0, %v49_v34  ;;  %v1351_v12 = vpack.c.bf16 %v340_v11, %v339_v10  ;;  %v526_v14 = vld [vmem:[%s1952_s5 + $0x8] sm:$0xff]  ;;  %v527_v15 = vld [vmem:[%s1952_s5 + $0x10] sm:$0xff]  ;;  %v528_v17 = vld [vmem:[%s1952_s5 + $0x18] sm:$0xff] }
  0x27   :  { %214 = vmatprep.mubr.f32.mxu0 %v1517_v0  ;;  %1336 = vmatpush3.bf16.msra.mxu1 %v1335_v42  ;;  %v1353_v16 = vpack.c.bf16 %v526_v14, %v525_v13  ;;  %v1357_v18 = vpack.c.bf16 %v528_v17, %v527_v15  ;;  %v529_v19 = vld [vmem:[%s1952_s5 + $0x20] sm:$0xff]  ;;  %v530_v20 = vld [vmem:[%s1952_s5 + $0x28] sm:$0xff]  ;;  %v531_v22 = vld [vmem:[%s1952_s5 + $0x30] sm:$0xff] }
  0x28   :  { %1338 = vmatprep.subr.bf16.mxu1 %v1337_v43  ;;  %v1361_v21 = vpack.c.bf16 %v530_v20, %v529_v19  ;;  %v532_v23 = vld [vmem:[%s1952_s5 + $0x38] sm:$0xff]  ;;  %v533_v25 = vld [vmem:[%s1952_s5 + $0x40] sm:$0xff]  ;;  %v534_v26 = vld [vmem:[%s1952_s5 + $0x48] sm:$0xff] }
  0x29   :  { %1354 = vmatprep.subr.bf16.mxu0 %v1353_v16  ;;  %v1365_v24 = vpack.c.bf16 %v532_v23, %v531_v22  ;;  %v1369_v27 = vpack.c.bf16 %v534_v26, %v533_v25  ;;  %v71_v31 = vld [vmem:[%s1949_s2] sm:$0x3] }
  0x2a   :  { %1045 = vmatmul.mubr.msk.f32.gmra.mrb[6].mxu0 %vm83_vm0, %v50_v41  ;;  %v1817_v33 = vrot.slane %v71_v31, %v75_v30  ;;  %v1819_v34 = vrot.slane %v71_v31, %v79_v32 }
  0x2b   :  { %220 = vmatprep.mubr.f32.mxu0 %v1517_v0  ;;  %1340 = vmatpush3.bf16.msra.mxu1 %v1339_v49 }
  0x2c   :  { %1342 = vmatprep.subr.bf16.mxu1 %v1341_v50  ;;  %1356 = vmatpush3.bf16.msra.mxu0 %v1353_v16 }
  0x2d   :  { %1358 = vmatprep.subr.bf16.mxu0 %v1357_v18 }
  0x2e   :  { %1046 = vmatmul.mubr.msk.f32.gmra.mrb[8].mxu0 %vm83_vm0, %v51_v48 }
  0x2f   :  { %226 = vmatprep.mubr.f32.mxu0 %v1517_v0  ;;  %1344 = vmatpush3.bf16.msra.mxu1 %v1343_v56 }
  0x30   :  { %1346 = vmatprep.subr.bf16.mxu1 %v1345_v57  ;;  %1360 = vmatpush3.bf16.msra.mxu0 %v1357_v18 }
  0x31   :  { %1362 = vmatprep.subr.bf16.mxu0 %v1361_v21 }
  0x32   :  { %1047 = vmatmul.mubr.msk.f32.gmra.mrb[10].mxu0 %vm83_vm0, %v52_v55 }
  0x33   :  { %232 = vmatprep.mubr.f32.mxu0 %v1517_v0  ;;  %1348 = vmatpush3.bf16.msra.mxu1 %v1347_v7 }
  0x34   :  { %1364 = vmatpush3.bf16.msra.mxu0 %v1361_v21 }
  0x35   :  { %1366 = vmatprep.subr.bf16.mxu0 %v1365_v24 }
  0x36   :  { %1048 = vmatmul.mubr.msk.f32.gmra.mrb[12].mxu0 %vm83_vm0, %v53_v58 }
  0x37   :  { %238 = vmatprep.mubr.f32.mxu0 %v1517_v0 }
  0x38   :  { %1368 = vmatpush3.bf16.msra.mxu0 %v1365_v24 }
  0x39   :  { %1370 = vmatprep.subr.bf16.mxu0 %v1369_v27 }
  0x3a   :  { %1049 = vmatmul.mubr.msk.f32.gmra.mrb[14].mxu0 %vm83_vm0, %v54_v59 }
  0x3b   :  { %244 = vmatprep.mubr.f32.mxu0 %v1517_v0 }
  0x3c   :  { %1372 = vmatpush3.bf16.msra.mxu0 %v1369_v27 }
  0x3e   :  { %1050 = vmatmul.mubr.msk.f32.gmra.mrb[16].mxu0 %vm83_vm0, %v55_v60 }
  0x3f   :  { %250 = vmatprep.mubr.f32.mxu0 %v1517_v0 }
  0x42   :  { %1051 = vmatmul.mubr.msk.f32.gmra.mrb[18].mxu0 %vm83_vm0, %v56_v61 }
  0x43   :  { %256 = vmatprep.mubr.f32.mxu0 %v1517_v0 }
  0x46   :  { %1052 = vmatmul.mubr.msk.f32.gmra.mrb[20].mxu0 %vm83_vm0, %v57_v62 }
  0x47   :  { %262 = vmatprep.mubr.f32.mxu0 %v1517_v0 }
  0x4a   :  { %1053 = vmatmul.mubr.msk.f32.gmra.mrb[22].mxu0 %vm83_vm0, %v58_v63 }
  0x4b   :  { %268 = vmatprep.mubr.f32.mxu0 %v1517_v0 }
  0x4e   :  { %1054 = vmatmul.mubr.msk.f32.gmra.mrb[24].mxu0 %vm83_vm0, %v59_v1 }
  0x4f   :  { %274 = vmatprep.mubr.f32.mxu0 %v1517_v0 }
  0x52   :  { %1055 = vmatmul.mubr.msk.f32.gmra.mrb[26].mxu0 %vm83_vm0, %v60_v2 }
  0x53   :  { %280 = vmatprep.mubr.f32.mxu0 %v1517_v0 }
  0x56   :  { %1056 = vmatmul.mubr.msk.f32.gmra.mrb[28].mxu0 %vm83_vm0, %v61_v3 }
  0x57   :  { %286 = vmatprep.mubr.f32.mxu0 %v1517_v0  ;;  %v355_v0 = vld [vmem:[%s1950_s3 + $0xf0] sm:$0xff] }
  0x58   :  { %v1349_v9 = vpack.c.bf16 %v356_v8, %v355_v0 }
  0x5a   :  { %1057 = vmatmul.mubr.msk.f32.gmra.mrb[30].mxu0 %vm83_vm0, %v62_v4  ;;  %1350 = vmatprep.subr.bf16.mxu1 %v1349_v9 }
  0x5b   :  { %1352 = vmatpush3.bf16.msra.mxu1 %v1351_v12 }
  0xf1   :  { %v198_v35 = vpop.f32.mrb[0].mxu0 }
  0xf2   :  { %v199_v36 = vadd.f32 %v198_v35, %v1817_v33  ;;  %v200_v37 = vpop.f32.mrb[1].mxu0 }
  0xf3   :  { %v201_v38 = vadd.f32 %v200_v37, %v1819_v34 }
  0xf4   :  { %v293_v41 = vmax.f32 %v199_v36, 0.0 }
  0xf5   :  { %v204_v39 = vpop.f32.mrb[2].mxu0  ;;  %v294_v40 = vmax.f32 %v201_v38, 0.0 }
  0xf6   :  { %v205_v42 = vadd.f32 %v204_v39, %v1817_v33  ;;  %v206_v43 = vpop.f32.mrb[3].mxu0 }
  0xf7   :  { %v207_v44 = vadd.f32 %v206_v43, %v1819_v34  ;;  %428 = vmatprep.mubr.f32.mxu1 %v294_v40 }
  0xf8   :  { %429 = vmatmul.mubr.f32.vlgmr.msra.gmra.mrb[0].mxu1 %v293_v41  ;;  %v295_v47 = vmax.f32 %v205_v42, 0.0 }
  0xf9   :  { %v296_v45 = vmax.f32 %v207_v44, 0.0  ;;  %v210_v46 = vpop.f32.mrb[4].mxu0 }
  0xfa   :  { %v211_v48 = vadd.f32 %v210_v46, %v1817_v33  ;;  %v212_v49 = vpop.f32.mrb[5].mxu0 }
  0xfb   :  { %v213_v50 = vadd.f32 %v212_v49, %v1819_v34  ;;  %433 = vmatprep.mubr.f32.mxu1 %v296_v45 }
  0xfc   :  { %434 = vmatmul.mubr.f32.gmra.mrb[2].mxu1 %v295_v47  ;;  %v297_v53 = vmax.f32 %v211_v48, 0.0 }
  0xfd   :  { %v298_v51 = vmax.f32 %v213_v50, 0.0  ;;  %v216_v52 = vpop.f32.mrb[6].mxu0 }
  0xfe   :  { %v217_v54 = vadd.f32 %v216_v52, %v1817_v33  ;;  %v218_v55 = vpop.f32.mrb[7].mxu0 }
  0xff   :  { %v219_v56 = vadd.f32 %v218_v55, %v1819_v34  ;;  %438 = vmatprep.mubr.f32.mxu1 %v298_v51 }
 0x100   :  { %439 = vmatmul.mubr.f32.gmra.mrb[4].mxu1 %v297_v53  ;;  %v299_v59 = vmax.f32 %v217_v54, 0.0 }
 0x101   :  { %v300_v57 = vmax.f32 %v219_v56, 0.0  ;;  %v222_v58 = vpop.f32.mrb[8].mxu0 }
 0x102   :  { %v223_v60 = vadd.f32 %v222_v58, %v1817_v33  ;;  %v224_v61 = vpop.f32.mrb[9].mxu0 }
 0x103   :  { %v225_v62 = vadd.f32 %v224_v61, %v1819_v34  ;;  %443 = vmatprep.mubr.f32.mxu1 %v300_v57 }
 0x104   :  { %444 = vmatmul.mubr.f32.gmra.mrb[6].mxu1 %v299_v59  ;;  %v301_v2 = vmax.f32 %v223_v60, 0.0 }
 0x105   :  { %v302_v63 = vmax.f32 %v225_v62, 0.0  ;;  %v228_v1 = vpop.f32.mrb[10].mxu0 }
 0x106   :  { %v229_v3 = vadd.f32 %v228_v1, %v1817_v33  ;;  %v230_v4 = vpop.f32.mrb[11].mxu0 }
 0x107   :  { %v231_v5 = vadd.f32 %v230_v4, %v1819_v34  ;;  %448 = vmatprep.mubr.f32.mxu1 %v302_v63 }
 0x108   :  { %449 = vmatmul.mubr.f32.gmra.mrb[8].mxu1 %v301_v2  ;;  %v303_v0 = vmax.f32 %v229_v3, 0.0 }
 0x109   :  { %v304_v6 = vmax.f32 %v231_v5, 0.0  ;;  %v234_v7 = vpop.f32.mrb[12].mxu0 }
 0x10a   :  { %v235_v8 = vadd.f32 %v234_v7, %v1817_v33  ;;  %v236_v9 = vpop.f32.mrb[13].mxu0  ;;  %v536_v7 = vld [vmem:[%s1952_s5 + $0x58] sm:$0xff] }
 0x10b   :  { %v237_v10 = vadd.f32 %v236_v9, %v1819_v34  ;;  %453 = vmatprep.mubr.f32.mxu1 %v304_v6  ;;  %v535_v6 = vld [vmem:[%s1952_s5 + $0x50] sm:$0xff] }
 0x10c   :  { %454 = vmatmul.mubr.f32.gmra.mrb[10].mxu1 %v303_v0  ;;  %v305_v13 = vmax.f32 %v235_v8, 0.0  ;;  %v1373_v0 = vpack.c.bf16 %v536_v7, %v535_v6  ;;  %v539_v9 = vld [vmem:[%s1952_s5 + $0x70] sm:$0xff] }
 0x10d   :  { %v306_v11 = vmax.f32 %v237_v10, 0.0  ;;  %v240_v12 = vpop.f32.mrb[14].mxu0  ;;  %v540_v10 = vld [vmem:[%s1952_s5 + $0x78] sm:$0xff] }
 0x10e   :  { %v241_v14 = vadd.f32 %v240_v12, %v1817_v33  ;;  %v242_v15 = vpop.f32.mrb[15].mxu0  ;;  %1374 = vmatprep.subr.bf16.mxu0 %v1373_v0  ;;  %v709_v12 = vld [vmem:[#allocation2] sm:$0xff] }
 0x10f   :  { %v243_v16 = vadd.f32 %v242_v15, %v1819_v34  ;;  %458 = vmatprep.mubr.f32.mxu1 %v306_v11  ;;  %1376 = vmatpush3.bf16.msra.mxu0 %v1373_v0  ;;  %v1381_v11 = vpack.c.bf16 %v540_v10, %v539_v9 }
 0x110   :  { %459 = vmatmul.mubr.f32.gmra.mrb[12].mxu1 %v305_v13  ;;  %v307_v19 = vmax.f32 %v241_v14, 0.0  ;;  %v710_v13 = vld [vmem:[#allocation2 + $0x8] sm:$0xff] }
 0x111   :  { %v308_v17 = vmax.f32 %v243_v16, 0.0  ;;  %v246_v18 = vpop.f32.mrb[16].mxu0  ;;  %v1385_v14 = vpack.c.bf16 %v710_v13, %v709_v12  ;;  %v1874_v16 = vld [vmem:[%s1951_s4] ss:$0 sm:$0xff] }
 0x112   :  { %v247_v20 = vadd.f32 %v246_v18, %v1817_v33  ;;  %v248_v21 = vpop.f32.mrb[17].mxu0 }
 0x113   :  { %v249_v22 = vadd.f32 %v248_v21, %v1819_v34  ;;  %463 = vmatprep.mubr.f32.mxu1 %v308_v17  ;;  %1393 = vmatprep.subr.bf16.mxu1 %v1385_v14 }
 0x114   :  { %464 = vmatmul.mubr.f32.gmra.mrb[14].mxu1 %v307_v19  ;;  %v309_v25 = vmax.f32 %v247_v20, 0.0 }
 0x115   :  { %v310_v23 = vmax.f32 %v249_v22, 0.0  ;;  %v252_v24 = vpop.f32.mrb[18].mxu0  ;;  %1395 = vmatpush3.bf16.msra.mxu1 %v1385_v14 }
 0x116   :  { %v253_v26 = vadd.f32 %v252_v24, %v1817_v33  ;;  %v254_v27 = vpop.f32.mrb[19].mxu0 }
 0x117   :  { %v255_v28 = vadd.f32 %v254_v27, %v1819_v34  ;;  %468 = vmatprep.mubr.f32.mxu1 %v310_v23 }
 0x118   :  { %469 = vmatmul.mubr.f32.gmra.mrb[16].mxu1 %v309_v25  ;;  %v311_v31 = vmax.f32 %v253_v26, 0.0 }
 0x119   :  { %v312_v29 = vmax.f32 %v255_v28, 0.0  ;;  %v258_v30 = vpop.f32.mrb[20].mxu0 }
 0x11a   :  { %v259_v32 = vadd.f32 %v258_v30, %v1817_v33  ;;  %v260_v35 = vpop.f32.mrb[21].mxu0 }
 0x11b   :  { %v261_v36 = vadd.f32 %v260_v35, %v1819_v34  ;;  %473 = vmatprep.mubr.f32.mxu1 %v312_v29 }
 0x11c   :  { %474 = vmatmul.mubr.f32.gmra.mrb[18].mxu1 %v311_v31  ;;  %v313_v39 = vmax.f32 %v259_v32, 0.0 }
 0x11d   :  { %v314_v37 = vmax.f32 %v261_v36, 0.0  ;;  %v264_v38 = vpop.f32.mrb[22].mxu0 }
 0x11e   :  { %v265_v40 = vadd.f32 %v264_v38, %v1817_v33  ;;  %v266_v41 = vpop.f32.mrb[23].mxu0 }
 0x11f   :  { %v267_v42 = vadd.f32 %v266_v41, %v1819_v34  ;;  %478 = vmatprep.mubr.f32.mxu1 %v314_v37 }
 0x120   :  { %479 = vmatmul.mubr.f32.gmra.mrb[20].mxu1 %v313_v39  ;;  %v315_v45 = vmax.f32 %v265_v40, 0.0 }
 0x121   :  { %v316_v43 = vmax.f32 %v267_v42, 0.0  ;;  %v270_v44 = vpop.f32.mrb[24].mxu0 }
 0x122   :  { %v271_v46 = vadd.f32 %v270_v44, %v1817_v33  ;;  %v272_v47 = vpop.f32.mrb[25].mxu0 }
 0x123   :  { %v273_v48 = vadd.f32 %v272_v47, %v1819_v34  ;;  %483 = vmatprep.mubr.f32.mxu1 %v316_v43 }
 0x124   :  { %484 = vmatmul.mubr.f32.gmra.mrb[22].mxu1 %v315_v45  ;;  %v317_v51 = vmax.f32 %v271_v46, 0.0 }
 0x125   :  { %v318_v49 = vmax.f32 %v273_v48, 0.0  ;;  %v276_v50 = vpop.f32.mrb[26].mxu0 }
 0x126   :  { %v277_v52 = vadd.f32 %v276_v50, %v1817_v33  ;;  %v278_v53 = vpop.f32.mrb[27].mxu0 }
 0x127   :  { %v279_v54 = vadd.f32 %v278_v53, %v1819_v34  ;;  %488 = vmatprep.mubr.f32.mxu1 %v318_v49 }
 0x128   :  { %489 = vmatmul.mubr.f32.gmra.mrb[24].mxu1 %v317_v51  ;;  %v319_v57 = vmax.f32 %v277_v52, 0.0 }
 0x129   :  { %v320_v55 = vmax.f32 %v279_v54, 0.0  ;;  %v282_v56 = vpop.f32.mrb[28].mxu0 }
 0x12a   :  { %v283_v58 = vadd.f32 %v282_v56, %v1817_v33  ;;  %v284_v59 = vpop.f32.mrb[29].mxu0 }
 0x12b   :  { %v285_v60 = vadd.f32 %v284_v59, %v1819_v34  ;;  %493 = vmatprep.mubr.f32.mxu1 %v320_v55 }
 0x12c   :  { %494 = vmatmul.mubr.f32.gmra.mrb[26].mxu1 %v319_v57  ;;  %v321_v63 = vmax.f32 %v283_v58, 0.0 }
 0x12d   :  { %v322_v61 = vmax.f32 %v285_v60, 0.0  ;;  %v288_v62 = vpop.f32.mrb[30].mxu0 }
 0x12e   :  { %v289_v1 = vadd.f32 %v288_v62, %v1817_v33  ;;  %v290_v2 = vpop.f32.mrb[31].mxu0  ;;  %v537_v33 = vld [vmem:[%s1952_s5 + $0x60] sm:$0xff] }
 0x12f   :  { %v291_v3 = vadd.f32 %v290_v2, %v1819_v34  ;;  %498 = vmatprep.mubr.f32.mxu1 %v322_v61  ;;  %v538_v34 = vld [vmem:[%s1952_s5 + $0x68] sm:$0xff] }
 0x130   :  { %499 = vmatmul.mubr.f32.gmra.mrb[28].mxu1 %v321_v63  ;;  %v323_v5 = vmax.f32 %v289_v1, 0.0  ;;  %v1377_v8 = vpack.c.bf16 %v538_v34, %v537_v33 }
 0x131   :  { %v324_v4 = vmax.f32 %v291_v3, 0.0 }
 0x132   :  { %1378 = vmatprep.subr.bf16.mxu0 %v1377_v8 }
 0x133   :  { %503 = vmatprep.mubr.f32.mxu1 %v324_v4  ;;  %1380 = vmatpush3.bf16.msra.mxu0 %v1377_v8 }
 0x134   :  { %504 = vmatmul.mubr.f32.gmra.mrb[30].mxu1 %v323_v5  ;;  %1382 = vmatprep.subr.bf16.mxu0 %v1381_v11 }
 0x137   :  { %1384 = vmatpush3.bf16.msra.mxu0 %v1381_v11 }
 0x138   :  { %1386 = vmatprep.subr.bf16.mxu0 %v1385_v14 }
 0x1cb   :  { %v1125_v15 = vpop.f32.mrb[0].mxu1 }
 0x1cc   :  { %v1126_v17 = vpop.f32.mrb[1].mxu1 }
 0x1cd   :  { %v1127_v18 = vadd.f32 %v1126_v17, %v1125_v15 }
 0x1cf   :  { %v431_v19 = vadd.f32 %v1127_v18, %v1874_v16  ;;  %v1128_v20 = vpop.f32.mrb[2].mxu1 }
 0x1d0   :  { %v1129_v21 = vpop.f32.mrb[3].mxu1 }
 0x1d1   :  { %v509_v22 = vmax.f32 %v431_v19, 0.0  ;;  %v1130_v23 = vadd.f32 %v1129_v21, %v1128_v20 }
 0x1d3   :  { %v436_v24 = vadd.f32 %v1130_v23, %v1874_v16  ;;  %v1131_v25 = vpop.f32.mrb[4].mxu1  ;;  %1257 = vmatprep.mubr.f32.mxu0 %v509_v22 }
 0x1d4   :  { %v1132_v26 = vpop.f32.mrb[5].mxu1 }
 0x1d5   :  { %v510_v27 = vmax.f32 %v436_v24, 0.0  ;;  %v1133_v28 = vadd.f32 %v1132_v26, %v1131_v25 }
 0x1d7   :  { %v441_v29 = vadd.f32 %v1133_v28, %v1874_v16  ;;  %v1134_v30 = vpop.f32.mrb[6].mxu1  ;;  %1258 = vmatmul.mubr.f32.vlgmr.msra.gmra.mrb[32].mxu0 %v510_v27 }
 0x1d8   :  { %v1135_v31 = vpop.f32.mrb[7].mxu1  ;;  %1388 = vmatpush3.bf16.msra.mxu0 %v1385_v14 }
 0x1d9   :  { %v511_v32 = vmax.f32 %v441_v29, 0.0  ;;  %v1136_v35 = vadd.f32 %v1135_v31, %v1134_v30 }
 0x1db   :  { %v446_v36 = vadd.f32 %v1136_v35, %v1874_v16  ;;  %v1137_v37 = vpop.f32.mrb[8].mxu1  ;;  %1260 = vmatprep.mubr.f32.mxu0 %v511_v32  ;;  %v711_v35 = vld [vmem:[#allocation2 + $0x10] sm:$0xff] }
 0x1dc   :  { %v1138_v38 = vpop.f32.mrb[9].mxu1 }
 0x1dd   :  { %v512_v39 = vmax.f32 %v446_v36, 0.0  ;;  %v1139_v40 = vadd.f32 %v1138_v38, %v1137_v37  ;;  %v712_v36 = vld [vmem:[#allocation2 + $0x18] sm:$0xff]  ;;  %v1059_v38 = vld [vmem:[%s1953_s6] ss:$0 sm:$0xff] }
 0x1de   :  { %v1389_v37 = vpack.c.bf16 %v712_v36, %v711_v35 }
 0x1df   :  { %v451_v41 = vadd.f32 %v1139_v40, %v1874_v16  ;;  %v1140_v42 = vpop.f32.mrb[10].mxu1  ;;  %1261 = vmatmul.mubr.f32.gmra.mrb[34].mxu0 %v512_v39 }
 0x1e0   :  { %v1141_v43 = vpop.f32.mrb[11].mxu1  ;;  %1390 = vmatprep.subr.bf16.mxu0 %v1389_v37  ;;  %1394 = vmatprep.subr.bf16.mxu1 %v1389_v37 }
 0x1e1   :  { %v513_v44 = vmax.f32 %v451_v41, 0.0  ;;  %v1142_v45 = vadd.f32 %v1141_v43, %v1140_v42  ;;  %1392 = vmatpush3.bf16.msra.mxu0 %v1389_v37  ;;  %1396 = vmatpush3.bf16.msra.mxu1 %v1389_v37 }
 0x1e3   :  { %v456_v46 = vadd.f32 %v1142_v45, %v1874_v16  ;;  %v1143_v47 = vpop.f32.mrb[12].mxu1  ;;  %1263 = vmatprep.mubr.f32.mxu0 %v513_v44 }
 0x1e4   :  { %v1144_v48 = vpop.f32.mrb[13].mxu1 }
 0x1e5   :  { %v514_v49 = vmax.f32 %v456_v46, 0.0  ;;  %v1145_v50 = vadd.f32 %v1144_v48, %v1143_v47 }
 0x1e7   :  { %v461_v51 = vadd.f32 %v1145_v50, %v1874_v16  ;;  %v1146_v52 = vpop.f32.mrb[14].mxu1  ;;  %1264 = vmatmul.mubr.f32.gmra.mrb[36].mxu0 %v514_v49 }
 0x1e8   :  { %v1147_v53 = vpop.f32.mrb[15].mxu1 }
 0x1e9   :  { %v515_v54 = vmax.f32 %v461_v51, 0.0  ;;  %v1148_v55 = vadd.f32 %v1147_v53, %v1146_v52 }
 0x1eb   :  { %v466_v56 = vadd.f32 %v1148_v55, %v1874_v16  ;;  %v1149_v57 = vpop.f32.mrb[16].mxu1  ;;  %1266 = vmatprep.mubr.f32.mxu0 %v515_v54 }
 0x1ec   :  { %v1150_v58 = vpop.f32.mrb[17].mxu1 }
 0x1ed   :  { %v516_v59 = vmax.f32 %v466_v56, 0.0  ;;  %v1151_v60 = vadd.f32 %v1150_v58, %v1149_v57 }
 0x1ef   :  { %v471_v61 = vadd.f32 %v1151_v60, %v1874_v16  ;;  %v1152_v62 = vpop.f32.mrb[18].mxu1  ;;  %1267 = vmatmul.mubr.f32.gmra.mrb[38].mxu0 %v516_v59 }
 0x1f0   :  { %v1153_v63 = vpop.f32.mrb[19].mxu1 }
 0x1f1   :  { %v517_v1 = vmax.f32 %v471_v61, 0.0  ;;  %v1154_v2 = vadd.f32 %v1153_v63, %v1152_v62 }
 0x1f3   :  { %v476_v3 = vadd.f32 %v1154_v2, %v1874_v16  ;;  %v1155_v4 = vpop.f32.mrb[20].mxu1  ;;  %1269 = vmatprep.mubr.f32.mxu0 %v517_v1 }
 0x1f4   :  { %v1156_v5 = vpop.f32.mrb[21].mxu1 }
 0x1f5   :  { %v518_v6 = vmax.f32 %v476_v3, 0.0  ;;  %v1157_v7 = vadd.f32 %v1156_v5, %v1155_v4 }
 0x1f7   :  { %v481_v0 = vadd.f32 %v1157_v7, %v1874_v16  ;;  %v1158_v33 = vpop.f32.mrb[22].mxu1  ;;  %1270 = vmatmul.mubr.f32.gmra.mrb[40].mxu0 %v518_v6 }
 0x1f8   :  { %v1159_v34 = vpop.f32.mrb[23].mxu1 }
 0x1f9   :  { %v519_v8 = vmax.f32 %v481_v0, 0.0  ;;  %v1160_v9 = vadd.f32 %v1159_v34, %v1158_v33 }
 0x1fb   :  { %v486_v10 = vadd.f32 %v1160_v9, %v1874_v16  ;;  %v1161_v11 = vpop.f32.mrb[24].mxu1  ;;  %1272 = vmatprep.mubr.f32.mxu0 %v519_v8 }
 0x1fc   :  { %v1162_v12 = vpop.f32.mrb[25].mxu1 }
 0x1fd   :  { %v520_v13 = vmax.f32 %v486_v10, 0.0  ;;  %v1163_v14 = vadd.f32 %v1162_v12, %v1161_v11 }
 0x1ff   :  { %v491_v15 = vadd.f32 %v1163_v14, %v1874_v16  ;;  %v1164_v17 = vpop.f32.mrb[26].mxu1  ;;  %1273 = vmatmul.mubr.f32.gmra.mrb[42].mxu0 %v520_v13 }
 0x200   :  { %v1165_v18 = vpop.f32.mrb[27].mxu1 }
 0x201   :  { %v521_v19 = vmax.f32 %v491_v15, 0.0  ;;  %v1166_v20 = vadd.f32 %v1165_v18, %v1164_v17 }
 0x203   :  { %v496_v21 = vadd.f32 %v1166_v20, %v1874_v16  ;;  %v1167_v22 = vpop.f32.mrb[28].mxu1  ;;  %1275 = vmatprep.mubr.f32.mxu0 %v521_v19 }
 0x204   :  { %v1168_v23 = vpop.f32.mrb[29].mxu1 }
 0x205   :  { %v522_v24 = vmax.f32 %v496_v21, 0.0  ;;  %v1169_v25 = vadd.f32 %v1168_v23, %v1167_v22  ;;  %v1914_v21 = vld [vmem:[%s1955_s8] ss:$0 sm:$0xff]  ;;  %s1518_s8 = smov [#allocation5]  }
 0x206   :  { %s1030_s21 = sshll.u32 %s1518_s8, 4  ;;  %s1031_s21 = int_to_ptr.vmem [resolvable:$true] %s1030_s21 }
 0x207   :  { %v501_v26 = vadd.f32 %v1169_v25, %v1874_v16  ;;  %v1170_v27 = vpop.f32.mrb[30].mxu1  ;;  %1276 = vmatmul.mubr.f32.gmra.mrb[44].mxu0 %v522_v24  ;;  %s1488_s22 = scalar_lea.vmem %s1031_s21, 2048  ;;  %p1493_p9 = scmp.lt.s32.totalorder %s1031_s21, %s1031_s21 }
 0x208   :  { %v1171_v28 = vpop.f32.mrb[31].mxu1  ;;  %p1489_p8 = scmp.ne.s32.totalorder %s1031_s21, %s1488_s22  ;;  %p1494_p10 = scmp.lt.s32.totalorder %s1488_s22, %s1488_s22 }
 0x209   :  { %v523_v29 = vmax.f32 %v501_v26, 0.0  ;;  %v1172_v30 = vadd.f32 %v1171_v28, %v1170_v27 }
 0x20a   :  { %p1495_p11 = por %p1494_p10, %p1493_p9 }
 0x20b   :  { %v506_v31 = vadd.f32 %v1172_v30, %v1874_v16  ;;  %1278 = vmatprep.mubr.f32.mxu0 %v523_v29 }
 0x20c   :  { %p1496_p12 = pnand %p1495_p11, %p1489_p8 }
 0x20d   :  { %v524_v32 = vmax.f32 %v506_v31, 0.0 }
 0x20f   :  { %1279 = vmatmul.mubr.f32.gmra.mrb[46].mxu0 %v524_v32 }
 0x2aa   :  { %v1259_v39 = vpop.f32.mrb[32].mxu0 }
 0x2ab   :  { %v620_v40 = vadd.f32 %v1259_v39, %v1059_v38  ;;  %v614_v41 = vpop.f32.mrb[33].mxu0 }
 0x2ac   :  { %v615_v42 = vadd.f32 %v1059_v38, %v614_v41 }
 0x2ad   :  { %v694_v16 = vmax.f32 %v620_v40, 0.0 }
 0x2ae   :  { %v693_v43 = vmax.f32 %v615_v42, 0.0 }
 0x2b0   :  { %1289 = vmatprep.mubr.msk.f32.mxu0 %vm83_vm0, %v693_v43 }
 0x2b1   :  { %1290 = vmatmul.mubr.msk.f32.vlgmr.msra.gmra.mrb[48].mxu0 %vm83_vm0, %v694_v16 }
 0x2b2   :  { %v1262_v44 = vpop.f32.mrb[34].mxu0 }
 0x2b3   :  { %v630_v45 = vadd.f32 %v1262_v44, %v1059_v38  ;;  %v624_v46 = vpop.f32.mrb[35].mxu0 }
 0x2b4   :  { %v625_v47 = vadd.f32 %v1059_v38, %v624_v46 }
 0x2b5   :  { %v696_v49 = vmax.f32 %v630_v45, 0.0 }
 0x2b6   :  { %v695_v48 = vmax.f32 %v625_v47, 0.0 }
 0x2b8   :  { %1292 = vmatprep.mubr.msk.f32.mxu0 %vm83_vm0, %v695_v48 }
 0x2b9   :  { %1293 = vmatmul.mubr.msk.f32.gmra.mrb[50].mxu0 %vm83_vm0, %v696_v49 }
 0x2ba   :  { %v1265_v50 = vpop.f32.mrb[36].mxu0 }
 0x2bb   :  { %v640_v51 = vadd.f32 %v1265_v50, %v1059_v38  ;;  %v634_v52 = vpop.f32.mrb[37].mxu0 }
 0x2bc   :  { %v635_v53 = vadd.f32 %v1059_v38, %v634_v52 }
 0x2bd   :  { %v698_v55 = vmax.f32 %v640_v51, 0.0 }
 0x2be   :  { %v697_v54 = vmax.f32 %v635_v53, 0.0 }
 0x2c0   :  { %1295 = vmatprep.mubr.msk.f32.mxu0 %vm83_vm0, %v697_v54 }
 0x2c1   :  { %1296 = vmatmul.mubr.msk.f32.gmra.mrb[52].mxu0 %vm83_vm0, %v698_v55 }
 0x2c2   :  { %v1268_v56 = vpop.f32.mrb[38].mxu0 }
 0x2c3   :  { %v650_v57 = vadd.f32 %v1268_v56, %v1059_v38  ;;  %v644_v58 = vpop.f32.mrb[39].mxu0 }
 0x2c4   :  { %v645_v59 = vadd.f32 %v1059_v38, %v644_v58 }
 0x2c5   :  { %v700_v61 = vmax.f32 %v650_v57, 0.0 }
 0x2c6   :  { %v699_v60 = vmax.f32 %v645_v59, 0.0 }
 0x2c8   :  { %1298 = vmatprep.mubr.msk.f32.mxu1 %vm83_vm0, %v699_v60 }
 0x2c9   :  { %1299 = vmatmul.mubr.msk.f32.vlgmr.msra.gmra.mrb[32].mxu1 %vm83_vm0, %v700_v61 }
 0x2ca   :  { %v1271_v62 = vpop.f32.mrb[40].mxu0 }
 0x2cb   :  { %v660_v63 = vadd.f32 %v1271_v62, %v1059_v38  ;;  %v654_v1 = vpop.f32.mrb[41].mxu0 }
 0x2cc   :  { %v655_v2 = vadd.f32 %v1059_v38, %v654_v1 }
 0x2cd   :  { %v702_v4 = vmax.f32 %v660_v63, 0.0 }
 0x2ce   :  { %v701_v3 = vmax.f32 %v655_v2, 0.0 }
 0x2d0   :  { %1301 = vmatprep.mubr.msk.f32.mxu1 %vm83_vm0, %v701_v3 }
 0x2d1   :  { %1302 = vmatmul.mubr.msk.f32.gmra.mrb[34].mxu1 %vm83_vm0, %v702_v4 }
 0x2d2   :  { %v1274_v5 = vpop.f32.mrb[42].mxu0 }
 0x2d3   :  { %v670_v6 = vadd.f32 %v1274_v5, %v1059_v38  ;;  %v664_v7 = vpop.f32.mrb[43].mxu0 }
 0x2d4   :  { %v665_v0 = vadd.f32 %v1059_v38, %v664_v7 }
 0x2d5   :  { %v704_v34 = vmax.f32 %v670_v6, 0.0 }
 0x2d6   :  { %v703_v33 = vmax.f32 %v665_v0, 0.0 }
 0x2d8   :  { %1304 = vmatprep.mubr.msk.f32.mxu1 %vm83_vm0, %v703_v33 }
 0x2d9   :  { %1305 = vmatmul.mubr.msk.f32.gmra.mrb[36].mxu1 %vm83_vm0, %v704_v34 }
 0x2da   :  { %v1277_v8 = vpop.f32.mrb[44].mxu0 }
 0x2db   :  { %v680_v9 = vadd.f32 %v1277_v8, %v1059_v38  ;;  %v674_v10 = vpop.f32.mrb[45].mxu0 }
 0x2dc   :  { %v675_v11 = vadd.f32 %v1059_v38, %v674_v10 }
 0x2dd   :  { %v706_v13 = vmax.f32 %v680_v9, 0.0 }
 0x2de   :  { %v705_v12 = vmax.f32 %v675_v11, 0.0 }
 0x2e0   :  { %1307 = vmatprep.mubr.msk.f32.mxu1 %vm83_vm0, %v705_v12 }
 0x2e1   :  { %1308 = vmatmul.mubr.msk.f32.gmra.mrb[38].mxu1 %vm83_vm0, %v706_v13 }
 0x2e2   :  { %v1280_v14 = vpop.f32.mrb[46].mxu0 }
 0x2e3   :  { %v690_v15 = vadd.f32 %v1280_v14, %v1059_v38  ;;  %v684_v17 = vpop.f32.mrb[47].mxu0 }
 0x2e4   :  { %v685_v18 = vadd.f32 %v1059_v38, %v684_v17 }
 0x2e5   :  { %v708_v20 = vmax.f32 %v690_v15, 0.0 }
 0x2e6   :  { %v707_v19 = vmax.f32 %v685_v18, 0.0 }
 0x2e8   :  { %1310 = vmatprep.mubr.msk.f32.mxu1 %vm83_vm0, %v707_v19 }
 0x2e9   :  { %1311 = vmatmul.mubr.msk.f32.gmra.mrb[40].mxu1 %vm83_vm0, %v708_v20 }
 0x384   :  { %v1291_v22 = vpop.f32.mrb[48].mxu0 }
 0x385   :  { %v840_v23 = vadd.f32 %v1291_v22, %v1914_v21  ;;  %v834_v24 = vpop.f32.mrb[49].mxu0 }
 0x386   :  { %v835_v25 = vadd.f32 %v1914_v21, %v834_v24 }
 0x387   :  { %v1078_v26 = vmul.f32 -1.442695, %v840_v23 }
 0x388   :  { %v1077_v27 = vmul.f32 -1.442695, %v835_v25 }
 0x389   :  { %1402 = vpow2.f32 %v1078_v26 }
 0x38a   :  { %1404 = vpow2.f32 %v1077_v27 }
 0x38c   :  { %v1294_v28 = vpop.f32.mrb[50].mxu0 }
 0x38d   :  { %v850_v29 = vadd.f32 %v1294_v28, %v1914_v21  ;;  %v844_v30 = vpop.f32.mrb[51].mxu0 }
 0x38e   :  { %v845_v31 = vadd.f32 %v1914_v21, %v844_v30 }
 0x38f   :  { %v1080_v32 = vmul.f32 -1.442695, %v850_v29 }
 0x390   :  { %v1079_v35 = vmul.f32 -1.442695, %v845_v31 }
 0x391   :  { %1406 = vpow2.f32 %v1080_v32 }
 0x392   :  { %1408 = vpow2.f32 %v1079_v35 }
 0x393   :  { %v1403_v36 = vpop.eup %1402 }
 0x394   :  { %v1405_v37 = vpop.eup %1404  ;;  %v962_v38 = vadd.f32 1.0, %v1403_v36  ;;  %v1297_v39 = vpop.f32.mrb[52].mxu0 }
 0x395   :  { %v961_v40 = vadd.f32 1.0, %v1405_v37  ;;  %v860_v41 = vadd.f32 %v1297_v39, %v1914_v21  ;;  %v854_v42 = vpop.f32.mrb[53].mxu0 }
 0x396   :  { %1410 = vrcp.f32 %v962_v38  ;;  %v855_v43 = vadd.f32 %v1914_v21, %v854_v42 }
 0x397   :  { %1412 = vrcp.f32 %v961_v40  ;;  %v1082_v16 = vmul.f32 -1.442695, %v860_v41 }
 0x398   :  { %v1081_v44 = vmul.f32 -1.442695, %v855_v43 }
 0x399   :  { %1414 = vpow2.f32 %v1082_v16 }
 0x39a   :  { %1416 = vpow2.f32 %v1081_v44 }
 0x39b   :  { %v1407_v45 = vpop.eup %1406 }
 0x39c   :  { %v1409_v46 = vpop.eup %1408  ;;  %v964_v47 = vadd.f32 1.0, %v1407_v45  ;;  %v1300_v48 = vpop.f32.mrb[32].mxu1 }
 0x39d   :  { %v963_v49 = vadd.f32 1.0, %v1409_v46  ;;  %v870_v50 = vadd.f32 %v1300_v48, %v1914_v21  ;;  %v864_v51 = vpop.f32.mrb[33].mxu1 }
 0x39e   :  { %1418 = vrcp.f32 %v964_v47  ;;  %v865_v52 = vadd.f32 %v1914_v21, %v864_v51 }
 0x39f   :  { %1420 = vrcp.f32 %v963_v49  ;;  %v1084_v53 = vmul.f32 -1.442695, %v870_v50 }
 0x3a0   :  { %v1411_v54 = vpop.eup %1410  ;;  %v1083_v55 = vmul.f32 -1.442695, %v865_v52 }
 0x3a1   :  { %v1413_v56 = vpop.eup %1412  ;;  %1010 = vst [vmem:[#allocation5 + $0x8] sm:$0xff] %v1411_v54  ;;  %1422 = vpow2.f32 %v1084_v53 }
 0x3a2   :  { %1009 = vst [vmem:[#allocation5] sm:$0xff] %v1413_v56  ;;  %1424 = vpow2.f32 %v1083_v55 }
 0x3a3   :  { %v1415_v57 = vpop.eup %1414 }
 0x3a4   :  { %v1417_v58 = vpop.eup %1416  ;;  %v966_v59 = vadd.f32 1.0, %v1415_v57  ;;  %v1303_v60 = vpop.f32.mrb[34].mxu1 }
 0x3a5   :  { %v965_v61 = vadd.f32 1.0, %v1417_v58  ;;  %v880_v62 = vadd.f32 %v1303_v60, %v1914_v21  ;;  %v874_v63 = vpop.f32.mrb[35].mxu1 }
 0x3a6   :  { %1426 = vrcp.f32 %v966_v59  ;;  %v875_v1 = vadd.f32 %v1914_v21, %v874_v63 }
 0x3a7   :  { %1428 = vrcp.f32 %v965_v61  ;;  %v1086_v2 = vmul.f32 -1.442695, %v880_v62 }
 0x3a8   :  { %v1419_v3 = vpop.eup %1418  ;;  %v1085_v4 = vmul.f32 -1.442695, %v875_v1 }
 0x3a9   :  { %v1421_v5 = vpop.eup %1420  ;;  %1012 = vst [vmem:[#allocation5 + $0x18] sm:$0xff] %v1419_v3  ;;  %1430 = vpow2.f32 %v1086_v2 }
 0x3aa   :  { %1011 = vst [vmem:[#allocation5 + $0x10] sm:$0xff] %v1421_v5  ;;  %1432 = vpow2.f32 %v1085_v4 }
 0x3ab   :  { %v1423_v6 = vpop.eup %1422 }
 0x3ac   :  { %v1425_v7 = vpop.eup %1424  ;;  %v968_v0 = vadd.f32 1.0, %v1423_v6  ;;  %v1306_v33 = vpop.f32.mrb[36].mxu1 }
 0x3ad   :  { %v967_v34 = vadd.f32 1.0, %v1425_v7  ;;  %v890_v8 = vadd.f32 %v1306_v33, %v1914_v21  ;;  %v884_v9 = vpop.f32.mrb[37].mxu1 }
 0x3ae   :  { %1434 = vrcp.f32 %v968_v0  ;;  %v885_v10 = vadd.f32 %v1914_v21, %v884_v9 }
 0x3af   :  { %1436 = vrcp.f32 %v967_v34  ;;  %v1088_v11 = vmul.f32 -1.442695, %v890_v8 }
 0x3b0   :  { %v1427_v12 = vpop.eup %1426  ;;  %v1087_v13 = vmul.f32 -1.442695, %v885_v10 }
 0x3b1   :  { %v1429_v14 = vpop.eup %1428  ;;  %1014 = vst [vmem:[#allocation5 + $0x28] sm:$0xff] %v1427_v12  ;;  %1438 = vpow2.f32 %v1088_v11 }
 0x3b2   :  { %1013 = vst [vmem:[#allocation5 + $0x20] sm:$0xff] %v1429_v14  ;;  %1440 = vpow2.f32 %v1087_v13 }
 0x3b3   :  { %v1431_v15 = vpop.eup %1430 }
 0x3b4   :  { %v1433_v17 = vpop.eup %1432  ;;  %v970_v18 = vadd.f32 1.0, %v1431_v15  ;;  %v1309_v19 = vpop.f32.mrb[38].mxu1 }
 0x3b5   :  { %v969_v20 = vadd.f32 1.0, %v1433_v17  ;;  %v900_v22 = vadd.f32 %v1309_v19, %v1914_v21  ;;  %v894_v23 = vpop.f32.mrb[39].mxu1 }
 0x3b6   :  { %1442 = vrcp.f32 %v970_v18  ;;  %v895_v24 = vadd.f32 %v1914_v21, %v894_v23 }
 0x3b7   :  { %1444 = vrcp.f32 %v969_v20  ;;  %v1090_v25 = vmul.f32 -1.442695, %v900_v22 }
 0x3b8   :  { %v1435_v26 = vpop.eup %1434  ;;  %v1089_v27 = vmul.f32 -1.442695, %v895_v24 }
 0x3b9   :  { %v1437_v28 = vpop.eup %1436  ;;  %1016 = vst [vmem:[#allocation5 + $0x38] sm:$0xff] %v1435_v26  ;;  %1446 = vpow2.f32 %v1090_v25 }
 0x3ba   :  { %1015 = vst [vmem:[#allocation5 + $0x30] sm:$0xff] %v1437_v28  ;;  %1448 = vpow2.f32 %v1089_v27 }
 0x3bb   :  { %v1439_v29 = vpop.eup %1438 }
 0x3bc   :  { %v1441_v30 = vpop.eup %1440  ;;  %v972_v31 = vadd.f32 1.0, %v1439_v29  ;;  %v1312_v32 = vpop.f32.mrb[40].mxu1 }
 0x3bd   :  { %v971_v35 = vadd.f32 1.0, %v1441_v30  ;;  %v910_v36 = vadd.f32 %v1312_v32, %v1914_v21  ;;  %v904_v37 = vpop.f32.mrb[41].mxu1 }
 0x3be   :  { %1450 = vrcp.f32 %v972_v31  ;;  %v905_v38 = vadd.f32 %v1914_v21, %v904_v37 }
 0x3bf   :  { %1452 = vrcp.f32 %v971_v35  ;;  %v1092_v39 = vmul.f32 -1.442695, %v910_v36 }
 0x3c0   :  { %v1443_v40 = vpop.eup %1442  ;;  %v1091_v41 = vmul.f32 -1.442695, %v905_v38 }
 0x3c1   :  { %v1445_v42 = vpop.eup %1444  ;;  %1018 = vst [vmem:[#allocation5 + $0x48] sm:$0xff] %v1443_v40  ;;  %1454 = vpow2.f32 %v1092_v39 }
 0x3c2   :  { %1017 = vst [vmem:[#allocation5 + $0x40] sm:$0xff] %v1445_v42  ;;  %1456 = vpow2.f32 %v1091_v41 }
 0x3c3   :  { %v1447_v43 = vpop.eup %1446 }
 0x3c4   :  { %v1449_v16 = vpop.eup %1448  ;;  %v974_v44 = vadd.f32 1.0, %v1447_v43 }
 0x3c5   :  { %v973_v45 = vadd.f32 1.0, %v1449_v16 }
 0x3c6   :  { %1458 = vrcp.f32 %v974_v44 }
 0x3c7   :  { %1460 = vrcp.f32 %v973_v45 }
 0x3c8   :  { %v1451_v46 = vpop.eup %1450 }
 0x3c9   :  { %v1453_v47 = vpop.eup %1452  ;;  %1020 = vst [vmem:[#allocation5 + $0x58] sm:$0xff] %v1451_v46 }
 0x3ca   :  { %1019 = vst [vmem:[#allocation5 + $0x50] sm:$0xff] %v1453_v47 }
 0x3cb   :  { %v1455_v21 = vpop.eup %1454 }
 0x3cc   :  { %v1457_v48 = vpop.eup %1456  ;;  %v976_v49 = vadd.f32 1.0, %v1455_v21 }
 0x3cd   :  { %v975_v50 = vadd.f32 1.0, %v1457_v48 }
 0x3ce   :  { %1462 = vrcp.f32 %v976_v49 }
 0x3cf   :  { %1464 = vrcp.f32 %v975_v50 }
 0x3d0   :  { %v1459_v51 = vpop.eup %1458 }
 0x3d1   :  { %v1461_v52 = vpop.eup %1460  ;;  %1022 = vst [vmem:[#allocation5 + $0x68] sm:$0xff] %v1459_v51 }
 0x3d2   :  { %1021 = vst [vmem:[#allocation5 + $0x60] sm:$0xff] %v1461_v52 }
 0x3d8   :  { %v1463_v53 = vpop.eup %1462 }
 0x3d9   :  { %v1465_v54 = vpop.eup %1464  ;;  %1024 = vst [vmem:[#allocation5 + $0x78] sm:$0xff] %v1463_v53 }
 0x3da   :  { %1023 = vst [vmem:[#allocation5 + $0x70] sm:$0xff] %v1465_v54 }
 0x3db   :  { %1499 = shalt.err (!%p1496_p12)
}
 0x3dc   :  { %s1500_s25 = scalar_lea.hbm %s1956_s9, 2048 }
 0x3dd   :  { %p1501_p13 = scmp.ne.s32.totalorder %s1956_s9, %s1500_s25  ;;  %p1504_p0 = scmp.lt.u32.totalorder %s1500_s25, %s1956_s9 }
 0x3df   :  { %p1506_p1 = pnand %p1504_p0, %p1501_p13 }
 0x3e1   :  { %1509 = shalt.err (!%p1506_p1)
}
 0x3e2   :  { %1036 = dma.vmem_to_hbm [thread:$0]  %s1031_s21, 2048, %s1956_s9, [#allocation4], %s1515_s19, %s1515_s19, %s1516_s20  }
 0x3e3   :  { %1512 = dma.done.wait [#allocation4], 2048  }
 0x3e4   :  { %1513 = vsyncadd [#allocation4], 4294965248 }
 0x3e5   :  { %1040 = vsyncpa [#allocation3], 1 }
 0x3e6   :  { %1041 = vsyncpa [#allocation4], 1 }

</bundles_post_ra>
